<compile_context>
chip_gen: v6e
topology: v6e:2x2x1
jax: 0.10.0
libtpu: 0.0.40
codegen_flags: <defaults>
</compile_context>

<pallas_src>
import functools

import jax
import jax.numpy as jnp
from jax.experimental import pallas as pl
from jax.experimental.pallas import tpu as pltpu

LN_EPS = 1e-5


# --------------------------------- helpers ----------------------------------
def _prod(xs):
    out = 1
    for s in xs:
        out *= s
    return out


def _round_up(x, m):
    return ((x + m - 1) // m) * m


def _device_kind():
    try:
        return jax.devices()[0].device_kind.lower()
    except Exception:
        return ""


def _mxu_tile():
    # 256-aligned N/K tiles for the 2x256x256 MXU on v6e/v7x; 128 on v5e.
    return 128 if "v5" in _device_kind() else 256


def _vmem_limits():
    """(vmem_limit_bytes for the compiler, tile-sizing budget)."""
    phys = None
    try:
        phys = int(pltpu.get_tpu_info().vmem_capacity_bytes)
    except Exception:
        phys = None
    if not phys:
        phys = (64 << 20) if "v7" in _device_kind() else (128 << 20)
    limit = max(16 << 20, min(phys // 2, 64 << 20))   # v5e/v6e: 64 MiB, v7x: 32 MiB
    budget = (limit * 3) // 4                          # headroom for compiler scratch
    return limit, budget


# ---------------------- fused LayerNorm + Linear kernel ----------------------
def _ln_matmul_kernel(*refs, n_k, tk, fuse_ln, use_xn, use_acc):
    it = iter(refs)
    x_ref = next(it)
    g_ref = next(it) if fuse_ln else None
    b_ref = next(it) if fuse_ln else None
    w_ref = next(it)
    bias_ref = next(it)
    o_ref = next(it)
    xn_ref = next(it) if use_xn else None
    acc_ref = next(it) if use_acc else None

    j = pl.program_id(1)
    k = pl.program_id(2)

    def _normalize():
        x = x_ref[...].astype(jnp.float32)
        mean = jnp.mean(x, axis=-1, keepdims=True)
        var = jnp.mean((x - mean) ** 2, axis=-1, keepdims=True)
        inv = jax.lax.rsqrt(var + LN_EPS)
        # gamma/beta are pre-cast to f32 once in module init (hoisted).
        return (x - mean) * inv * g_ref[...] + b_ref[...]

    if use_acc:
        @pl.when(k == 0)
        def _init_acc():
            acc_ref[...] = jnp.zeros_like(acc_ref)

    if fuse_ln and use_xn:
        # LayerNorm once per ROW tile (not per N tile): the x block index only
        # depends on i, so the normalized tile is valid for the whole j/k
        # sweep of this row tile.  Requires j axis to be "arbitrary".
        @pl.when((j == 0) & (k == 0))
        def _ln():
            xn_ref[...] = _normalize().astype(xn_ref.dtype)

    if fuse_ln and not use_xn:
        # Single (j, k) step per row tile: normalize into a value, no scratch.
        lhs = _normalize().astype(w_ref.dtype)
    else:
        src = xn_ref if fuse_ln else x_ref
        if n_k == 1:
            lhs = src[...]
        else:
            start = pl.multiple_of(k * tk, tk)
            lhs = src[:, pl.ds(start, tk)]
        lhs = lhs.astype(w_ref.dtype)

    part = jnp.dot(lhs, w_ref[...], preferred_element_type=jnp.float32)

    if use_acc:
        acc_ref[...] += part

        @pl.when(k == n_k - 1)
        def _finalize():
            o_ref[...] = (acc_ref[...] + bias_ref[...]).astype(o_ref.dtype)
    else:
        # n_k == 1: write the output tile directly (no accumulator RMW).
        o_ref[...] = (part + bias_ref[...]).astype(o_ref.dtype)


@functools.partial(jax.jit, static_argnames=("d_out", "fuse_ln"))
def _ln_linear_prepared(x, g2, b2, w2, bias2, *, d_out, fuse_ln):
    """y = (LayerNorm(x) if fuse_ln else x) @ w + bias, one fused pallas_call.

    w2 is pre-padded to a 128-multiple of output features; bias2 / g2 / b2 are
    pre-cast f32 rows of shape (1, ...).
    """
    orig_shape = x.shape
    d_in = orig_shape[-1]
    d_out_p = w2.shape[-1]
    rows = _prod(orig_shape[:-1])

    x_itemsize = jnp.dtype(x.dtype).itemsize
    w_itemsize = jnp.dtype(w2.dtype).itemsize
    out_itemsize = x_itemsize
    mxu = _mxu_tile()
    kind = _device_kind()
    limit, budget = _vmem_limits()

    # Sublane packing: tm must be a multiple of 8 (f32) / 16 (bf16) / 32 (i8).
    sub = 32 // max(1, min(x_itemsize, w_itemsize))

    # K tile (weight streaming).  Only aligned K tiles are streamed; otherwise
    # the whole K is taken in one step (legal: block dim == full array dim).
    tk = d_in
    for cand in (2 * mxu, mxu, 128):
        if cand <= d_in and d_in % cand == 0:
            tk = cand
            break
    n_k = d_in // tk

    # N tile candidates (lane-dense).  v5e prefers small N tiles (store-slot
    # bound, 4x128^2 MXU); v7x caps at 1024 to respect its smaller VMEM.
    tn_cap = 256 if "v5" in kind else (1024 if "v7" in kind else d_out_p)
    tn_cands = []
    for c in (d_out_p, 2048, 1024, 512, 256, 128):
        if c <= d_out_p and d_out_p % c == 0 and (c <= tn_cap or c == 128):
            if c not in tn_cands:
                tn_cands.append(c)

    def _vmem_bytes(tm_, tn_):
        n_j_ = d_out_p // tn_
        use_xn_ = fuse_ln and (n_j_ > 1 or n_k > 1)
        use_acc_ = n_k > 1
        total = 2 * tm_ * d_in * x_itemsize          # x tile, double-buffered
        total += 2 * tk * tn_ * w_itemsize           # weight tile
        total += 2 * tm_ * tn_ * out_itemsize        # output tile
        total += 2 * tn_ * 4                         # bias tile (f32)
        if fuse_ln:
            total += 2 * 2 * d_in * 4                # gamma + beta tiles (f32)
        if use_xn_:
            total += tm_ * d_in * w_itemsize         # normalized-x scratch
        if use_acc_:
            total += tm_ * tn_ * 4                   # f32 accumulator
        return total

    # Row (M) tile: aim big (fewer weight re-reads), shrink until a (tm, tn)
    # pair fits the per-generation VMEM budget.
    tm = _round_up(min(512, _round_up(rows, sub)), sub)
    tn = None
    while True:
        for c in tn_cands:
            if _vmem_bytes(tm, c) <= budget:
                tn = c
                break
        if tn is not None or tm <= sub:
            break
        tm = max(sub, ((tm // 2) // sub) * sub)
    if tn is None:
        tn = 128   # last resort; compiler still gets vmem_limit_bytes

    # v7x has 2 TensorCores sharded over the "parallel" row axis: make sure
    # there are at least 2 row tiles when there are enough rows.
    if "v7" in kind and rows > sub and _round_up(rows, tm) // tm == 1:
        tm_half = _round_up((rows + 1) // 2, sub)
        if tm_half < tm:
            tm = tm_half

    rows_p = _round_up(rows, tm)
    n_i = rows_p // tm
    n_j = d_out_p // tn
    use_xn = fuse_ln and (n_j > 1 or n_k > 1)
    use_acc = n_k > 1

    x2 = x.reshape(rows, d_in)
    if rows_p != rows:
        x2 = jnp.pad(x2, ((0, rows_p - rows), (0, 0)))

    inputs = [x2]
    in_specs = [pl.BlockSpec((tm, d_in), lambda i, j, k: (i, 0))]
    if fuse_ln:
        inputs += [g2, b2]
        in_specs += [pl.BlockSpec((1, d_in), lambda i, j, k: (0, 0)),
                     pl.BlockSpec((1, d_in), lambda i, j, k: (0, 0))]
    inputs += [w2, bias2]
    in_specs += [pl.BlockSpec((tk, tn), lambda i, j, k: (k, j)),
                 pl.BlockSpec((1, tn), lambda i, j, k: (0, j))]

    scratch_shapes = []
    if use_xn:
        scratch_shapes.append(pltpu.VMEM((tm, d_in), w2.dtype))
    if use_acc:
        scratch_shapes.append(pltpu.VMEM((tm, tn), jnp.float32))

    # The normalized-x scratch is only valid if each core starts its row tile
    # at (j=0, k=0) -> j must be "arbitrary" when the scratch is reused.
    j_sem = "arbitrary" if use_xn else "parallel"

    kernel = functools.partial(_ln_matmul_kernel, n_k=n_k, tk=tk,
                               fuse_ln=fuse_ln, use_xn=use_xn, use_acc=use_acc)

    out = pl.pallas_call(
        kernel,
        out_shape=jax.ShapeDtypeStruct((rows_p, d_out_p), x.dtype),
        grid_spec=pltpu.PrefetchScalarGridSpec(
            num_scalar_prefetch=0,
            grid=(n_i, n_j, n_k),
            in_specs=in_specs,
            out_specs=pl.BlockSpec((tm, tn), lambda i, j, k: (i, j)),
            scratch_shapes=scratch_shapes,
        ),
        compiler_params=pltpu.CompilerParams(
            dimension_semantics=("parallel", j_sem, "arbitrary"),
            vmem_limit_bytes=limit),
    )(*inputs)

    out = out[:rows, :d_out]
    return out.reshape(orig_shape[:-1] + (d_out,))


# ---------------------- standalone LayerNorm (generic fn) --------------------
def _layernorm_kernel(x_ref, g_ref, b_ref, o_ref):
    x = x_ref[...].astype(jnp.float32)
    mean = jnp.mean(x, axis=-1, keepdims=True)
    var = jnp.mean((x - mean) ** 2, axis=-1, keepdims=True)
    inv = jax.lax.rsqrt(var + LN_EPS)
    o_ref[...] = ((x - mean) * inv * g_ref[...] + b_ref[...]).astype(o_ref.dtype)


@functools.partial(jax.jit, static_argnames=("tile_rows",))
def layernorm_pallas(x, gamma, beta, *, tile_rows=1024):
    """LayerNorm over the last dim of x; row-tiled so DMA pipelines."""
    orig_shape = x.shape
    d = orig_shape[-1]
    rows = _prod(orig_shape[:-1])
    itemsize = jnp.dtype(x.dtype).itemsize
    sub = 32 // max(1, itemsize)
    limit, budget = _vmem_limits()

    # Purely HBM-bound: size each buffered tile at ~budget/6 (in + out double
    # buffered plus f32 temps), generation-aware via the derived budget.
    per_tile = max(512 * 1024, budget // 6)
    max_tr = max(sub, (per_tile // max(1, d * itemsize) // sub) * sub)
    tr = max(sub, (min(tile_rows, _round_up(rows, sub), max_tr) // sub) * sub)
    rows_p = _round_up(rows, tr)

    x2 = x.reshape(rows, d)
    if rows_p != rows:
        x2 = jnp.pad(x2, ((0, rows_p - rows), (0, 0)))
    g2 = jnp.asarray(gamma).reshape(1, d).astype(jnp.float32)
    b2 = jnp.asarray(beta).reshape(1, d).astype(jnp.float32)

    out = pl.pallas_call(
        _layernorm_kernel,
        out_shape=jax.ShapeDtypeStruct((rows_p, d), x.dtype),
        grid_spec=pltpu.PrefetchScalarGridSpec(
            num_scalar_prefetch=0,
            grid=(rows_p // tr,),
            in_specs=[
                pl.BlockSpec((tr, d), lambda i: (i, 0)),
                pl.BlockSpec((1, d), lambda i: (0, 0)),
                pl.BlockSpec((1, d), lambda i: (0, 0)),
            ],
            out_specs=pl.BlockSpec((tr, d), lambda i: (i, 0)),
        ),
        compiler_params=pltpu.CompilerParams(
            dimension_semantics=("parallel",),
            vmem_limit_bytes=limit),
    )(x2, g2, b2)
    return out[:rows].reshape(orig_shape)


# ------------------------------- module wrappers -----------------------------
class PallasLinear:
    """Linear(d_in, d_out): tiled Pallas matmul kernel (no LayerNorm)."""

    def __init__(self, w, b):
        w = jnp.asarray(w)
        b = jnp.asarray(b)
        self.d_out = int(w.shape[-1])
        d_out_p = _round_up(self.d_out, 128)
        # Padding / f32 cast hoisted to init (once, not per forward).
        self.w_p = w if d_out_p == self.d_out else jnp.pad(
            w, ((0, 0), (0, d_out_p - self.d_out)))
        bias = b.reshape(1, -1).astype(jnp.float32)
        self.bias_p = bias if d_out_p == self.d_out else jnp.pad(
            bias, ((0, 0), (0, d_out_p - self.d_out)))

    def __call__(self, x):
        return _ln_linear_prepared(x, None, None, self.w_p, self.bias_p,
                                   d_out=self.d_out, fuse_ln=False)


class PreNormPallas:
    """PreNorm: y = fn(LayerNorm(x), **kwargs) with nn.LayerNorm defaults."""

    def __init__(self, dim, fn, dtype=jnp.float32):
        self.dim = dim
        self.fn = fn
        # nn.LayerNorm default init, pre-cast/reshaped once (hoisted).
        self.gamma = jnp.ones((1, dim), jnp.float32)
        self.beta = jnp.zeros((1, dim), jnp.float32)

    def __call__(self, x, **kwargs):
        if isinstance(self.fn, PallasLinear) and not kwargs:
            # Hot path: LN fused into the tiled matmul -> the normalized
            # activation never round-trips through HBM.
            return _ln_linear_prepared(x, self.gamma, self.beta,
                                       self.fn.w_p, self.fn.bias_p,
                                       d_out=self.fn.d_out, fuse_ln=True)
        # Generic fn: standalone tiled LayerNorm kernel, then fn.
        # TODO(synk): arbitrary `fn` bodies are not fused into the LN kernel.
        normed = layernorm_pallas(x, self.gamma, self.beta)
        return self.fn(normed, **kwargs)


# ----------------------------------- main ------------------------------------
if __name__ == "__main__":
    key = jax.random.PRNGKey(0)
    k1, k2, k3, k4, k5 = jax.random.split(key, 5)

    def ref_prenorm_linear(x, w, b):
        mean = jnp.mean(x, axis=-1, keepdims=True)
        var = jnp.mean((x - mean) ** 2, axis=-1, keepdims=True)
        xn = (x - mean) / jnp.sqrt(var + LN_EPS)
        return xn @ w + b, xn

    # --- Config A: single-step fast path (no K tiling, no scratch) ----------
    B, N, D = 2, 8, 256
    x = jax.random.normal(k1, (B, N, D), dtype=jnp.float32)
    w = jax.random.normal(k2, (D, D), dtype=jnp.float32) * 0.02
    b = jax.random.normal(k3, (D,), dtype=jnp.float32) * 0.02

    prenorm = PreNormPallas(D, PallasLinear(w, b))
    out = jax.block_until_ready(prenorm(x))
    ref, ref_norm = ref_prenorm_linear(x, w, b)
    assert out.shape == (B, N, D)
    assert jnp.allclose(out, ref, atol=2e-3, rtol=2e-3), \
        float(jnp.max(jnp.abs(out - ref)))

    # Generic-fn fallback: standalone LN kernel + identity fn.
    prenorm_id = PreNormPallas(D, lambda t: t)
    ln_out = jax.block_until_ready(prenorm_id(x))
    assert jnp.allclose(ln_out, ref_norm, atol=1e-4, rtol=1e-4)

    # --- Config B: K-tiled path (accumulator + cached normalized tile) ------
    B2, N2, D2, DO2 = 2, 64, 384, 512
    x2 = jax.random.normal(k4, (B2, N2, D2), dtype=jnp.float32)
    w2 = jax.random.normal(k5, (D2, DO2), dtype=jnp.float32) * 0.02
    b2 = jnp.zeros((DO2,), dtype=jnp.float32)

    prenorm2 = PreNormPallas(D2, PallasLinear(w2, b2))
    out2 = jax.block_until_ready(prenorm2(x2))
    ref2, _ = ref_prenorm_linear(x2, w2, b2)
    assert out2.shape == (B2, N2, DO2)
    assert jnp.allclose(out2, ref2, atol=2e-3, rtol=2e-3), \
        float(jnp.max(jnp.abs(out2 - ref2)))

    # Plain Linear (no LN) path.
    lin_out = jax.block_until_ready(PallasLinear(w2, b2)(x2))
    ref_lin = x2 @ w2 + b2
    assert jnp.allclose(lin_out, ref_lin, atol=2e-3, rtol=2e-3)

    print("KERNEL_OK")
</pallas_src>

<mosaic_0001>
module attributes {stable_mosaic.version = 11 : i64} {
  func.func @_ln_matmul_kernel(%arg0: i32, %arg1: i32, %arg2: i32, %arg3: memref<16x256xf32, #tpu.memory_space<vmem>>, %arg4: memref<1x256xf32, #tpu.memory_space<vmem>>, %arg5: memref<1x256xf32, #tpu.memory_space<vmem>>, %arg6: memref<256x256xf32, #tpu.memory_space<vmem>>, %arg7: memref<1x256xf32, #tpu.memory_space<vmem>>, %arg8: memref<16x256xf32, #tpu.memory_space<vmem>>) attributes {dimension_semantics = [#tpu.dimension_semantics<parallel>, #tpu.dimension_semantics<parallel>, #tpu.dimension_semantics<arbitrary>], iteration_bounds = array<i64: 1, 1, 1>, scalar_prefetch = 0 : i64, scratch_operands = 0 : i64, tpu.core_type = #tpu.core_type<tc>, window_params = [{transform_indices = @transform_0, window_bounds = array<i64: 16, 256>}, {pipeline_mode = #tpu.pipeline_mode<synchronous>, transform_indices = @transform_1, window_bounds = array<i64: 1, 256>}, {pipeline_mode = #tpu.pipeline_mode<synchronous>, transform_indices = @transform_2, window_bounds = array<i64: 1, 256>}, {transform_indices = @transform_3, window_bounds = array<i64: 256, 256>}, {transform_indices = @transform_4, window_bounds = array<i64: 1, 256>}, {transform_indices = @transform_5, window_bounds = array<i64: 16, 256>}]} {
    %c0 = arith.constant 0 : index
    %c0_0 = arith.constant 0 : index
    %0 = vector.load %arg3[%c0, %c0_0] : memref<16x256xf32, #tpu.memory_space<vmem>>, vector<16x256xf32>
    %cst = arith.constant dense<0.000000e+00> : vector<16xf32>
    %1 = vector.multi_reduction <add>, %0, %cst [1] : vector<16x256xf32> to vector<16xf32>
    %2 = vector.shape_cast %1 : vector<16xf32> to vector<16x1xf32>
    %cst_1 = arith.constant 2.560000e+02 : f32
    %3 = vector.broadcast %cst_1 : f32 to vector<16x1xf32>
    %4 = arith.divf %2, %3 : vector<16x1xf32>
    %5 = vector.broadcast %4 : vector<16x1xf32> to vector<16x256xf32>
    %6 = arith.subf %0, %5 : vector<16x256xf32>
    %7 = arith.mulf %6, %6 : vector<16x256xf32>
    %cst_2 = arith.constant dense<0.000000e+00> : vector<16xf32>
    %8 = vector.multi_reduction <add>, %7, %cst_2 [1] : vector<16x256xf32> to vector<16xf32>
    %9 = vector.shape_cast %8 : vector<16xf32> to vector<16x1xf32>
    %cst_3 = arith.constant 2.560000e+02 : f32
    %10 = vector.broadcast %cst_3 : f32 to vector<16x1xf32>
    %11 = arith.divf %9, %10 : vector<16x1xf32>
    %cst_4 = arith.constant 9.99999974E-6 : f32
    %12 = vector.broadcast %cst_4 : f32 to vector<16x1xf32>
    %13 = arith.addf %11, %12 : vector<16x1xf32>
    %14 = math.rsqrt %13 : vector<16x1xf32>
    %15 = vector.broadcast %4 : vector<16x1xf32> to vector<16x256xf32>
    %16 = arith.subf %0, %15 : vector<16x256xf32>
    %17 = vector.broadcast %14 : vector<16x1xf32> to vector<16x256xf32>
    %18 = arith.mulf %16, %17 : vector<16x256xf32>
    %c0_5 = arith.constant 0 : index
    %c0_6 = arith.constant 0 : index
    %19 = vector.load %arg4[%c0_5, %c0_6] : memref<1x256xf32, #tpu.memory_space<vmem>>, vector<1x256xf32>
    %20 = vector.broadcast %19 : vector<1x256xf32> to vector<16x256xf32>
    %21 = arith.mulf %18, %20 : vector<16x256xf32>
    %c0_7 = arith.constant 0 : index
    %c0_8 = arith.constant 0 : index
    %22 = vector.load %arg5[%c0_7, %c0_8] : memref<1x256xf32, #tpu.memory_space<vmem>>, vector<1x256xf32>
    %23 = vector.broadcast %22 : vector<1x256xf32> to vector<16x256xf32>
    %24 = arith.addf %21, %23 : vector<16x256xf32>
    %c0_9 = arith.constant 0 : index
    %c0_10 = arith.constant 0 : index
    %25 = vector.load %arg6[%c0_9, %c0_10] : memref<256x256xf32, #tpu.memory_space<vmem>>, vector<256x256xf32>
    %cst_11 = arith.constant dense<0.000000e+00> : vector<16x256xf32>
    %26 = tpu.matmul %24, %25, %cst_11 {dimension_numbers = #tpu.dot_dimension_numbers<[1], [0], [0], [1], [0, 0, 1, 1], [], []>} : vector<16x256xf32>, vector<256x256xf32>, vector<16x256xf32> -> vector<16x256xf32>
    %c0_12 = arith.constant 0 : index
    %c0_13 = arith.constant 0 : index
    %27 = vector.load %arg7[%c0_12, %c0_13] : memref<1x256xf32, #tpu.memory_space<vmem>>, vector<1x256xf32>
    %28 = vector.broadcast %27 : vector<1x256xf32> to vector<16x256xf32>
    %29 = arith.addf %26, %28 : vector<16x256xf32>
    %c0_14 = arith.constant 0 : index
    %c0_15 = arith.constant 0 : index
    %30 = vector.load %arg8[%c0_14, %c0_15] : memref<16x256xf32, #tpu.memory_space<vmem>>, vector<16x256xf32>
    tpu.vector_store %arg8[%c0_14, %c0_15], %29 {strides = array<i32>} : memref<16x256xf32, #tpu.memory_space<vmem>>, vector<16x256xf32>,
    return
  }
  func.func @transform_0(%arg0: i32, %arg1: i32, %arg2: i32) -> (i32, i32) {
    %c0_i32 = arith.constant 0 : i32
    %c0_i32_0 = arith.constant 0 : i32
    return %arg0, %c0_i32 : i32, i32
  }
  func.func @transform_1(%arg0: i32, %arg1: i32, %arg2: i32) -> (i32, i32) {
    %c0_i32 = arith.constant 0 : i32
    %c0_i32_0 = arith.constant 0 : i32
    %c0_i32_1 = arith.constant 0 : i32
    return %c0_i32, %c0_i32_0 : i32, i32
  }
  func.func @transform_2(%arg0: i32, %arg1: i32, %arg2: i32) -> (i32, i32) {
    %c0_i32 = arith.constant 0 : i32
    %c0_i32_0 = arith.constant 0 : i32
    %c0_i32_1 = arith.constant 0 : i32
    return %c0_i32, %c0_i32_0 : i32, i32
  }
  func.func @transform_3(%arg0: i32, %arg1: i32, %arg2: i32) -> (i32, i32) {
    %c0_i32 = arith.constant 0 : i32
    return %arg2, %arg1 : i32, i32
  }
  func.func @transform_4(%arg0: i32, %arg1: i32, %arg2: i32) -> (i32, i32) {
    %c0_i32 = arith.constant 0 : i32
    %c0_i32_0 = arith.constant 0 : i32
    return %c0_i32, %arg1 : i32, i32
  }
  func.func @transform_5(%arg0: i32, %arg1: i32, %arg2: i32) -> (i32, i32) {
    %c0_i32 = arith.constant 0 : i32
    return %arg0, %arg1 : i32, i32
  }
}

</mosaic_0001>

<bundles_post_ra>
// kernel: _ln_linear_prepared.1
= control target key start
LH: loop header
LB: loop body
LE: loop exit
PB: predicated region body
PF: predicated region fallthrough
CT: control target
= control target key end

     0   :  { %10 = vsyncpa [#allocation3], 0  ;;  %s530_s0 = inlined_call_operand.hbm [shape: f32[16,256], index: 0, kind: input, shape index: {}]   ;;  %s531_s1 = inlined_call_operand.vmem [shape: f32[1,256], index: 1, kind: input, shape index: {}]   ;;  %s532_s2 = inlined_call_operand.vmem [shape: f32[1,256], index: 2, kind: input, shape index: {}]   ;;  %s533_s3 = inlined_call_operand.hbm [shape: f32[256,256], index: 3, kind: input, shape index: {}]   ;;  %s534_s4 = inlined_call_operand.vmem [shape: f32[1,256], index: 4, kind: input, shape index: {}]   ;;  %s535_s5 = inlined_call_operand.hbm [shape: f32[16,256], index: 5, kind: output, shape index: {}]  }
   0x1   :  { %11 = vsyncpa [#allocation6], 0 }
   0x2   :  { %12 = vsyncpa [#allocation4], 0  ;;  %s432_s18 = smov [#allocation2]  }
   0x3   :  { %s18_s19 = sshll.u32 %s432_s18, 4  ;;  %s19_s19 = int_to_ptr.vmem [resolvable:$true] %s18_s19 }
   0x4   :  { %s374_s20 = scalar_lea.vmem %s19_s19, 512  ;;  %p379_p1 = scmp.lt.s32.totalorder %s19_s19, %s19_s19 }
   0x5   :  { %p375_p0 = scmp.ne.s32.totalorder %s19_s19, %s374_s20  ;;  %p380_p2 = scmp.lt.s32.totalorder %s374_s20, %s374_s20 }
   0x7   :  { %p381_p3 = por %p380_p2, %p379_p1 }
   0x9   :  { %p382_p4 = pnand %p381_p3, %p375_p0 }
   0xb   :  { %385 = shalt.err (!%p382_p4)
}
   0xc   :  { %s433_s21 = smov 256   ;;  %s434_s22 = smov 16  }
   0xd   :  { %24 = dma.hbm_to_vmem [thread:$0]  %s530_s0, 512, %s19_s19, [#allocation3], %s433_s21, %s433_s21, %s434_s22  }
   0xe   :  { %s435_s25 = smov [#allocation5]  }
   0xf   :  { %s34_s26 = sshll.u32 %s435_s25, 4  ;;  %s35_s26 = int_to_ptr.vmem [resolvable:$true] %s34_s26 }
  0x10   :  { %s394_s27 = scalar_lea.vmem %s35_s26, 8192  ;;  %p399_p6 = scmp.lt.s32.totalorder %s35_s26, %s35_s26 }
  0x11   :  { %p395_p5 = scmp.ne.s32.totalorder %s35_s26, %s394_s27  ;;  %p400_p7 = scmp.lt.s32.totalorder %s394_s27, %s394_s27 }
  0x13   :  { %p401_p8 = por %p400_p7, %p399_p6 }
  0x15   :  { %p402_p9 = pnand %p401_p8, %p395_p5 }
  0x17   :  { %405 = shalt.err (!%p402_p9)
}
  0x18   :  { %40 = dma.hbm_to_vmem [thread:$0]  %s533_s3, 8192, %s35_s26, [#allocation6], %s433_s21, %s433_s21, %s434_s22  }
  0x19   :  { %426 = dma.done.wait [#allocation3], 512  }
  0x1a   :  { %427 = vsyncadd [#allocation3], 4294966784 }
  0x1b   :  { %428 = dma.done.wait [#allocation6], 8192  }
  0x1c   :  { %429 = vsyncadd [#allocation6], 4294959104  ;;  %v479_v0 = vld [vmem:[#allocation2] sm:$0xff]  ;;  %v481_v1 = vld [vmem:[#allocation2 + $0x8] sm:$0xff]  ;;  %s436_s7 = smov [#allocation7]  }
  0x1d   :  { %v483_v2 = vld [vmem:[#allocation2 + $0x10] sm:$0xff]  ;;  %v53_v3 = vadd.f32 %v481_v1, %v479_v0  ;;  %v487_v4 = vld [vmem:[#allocation2 + $0x18] sm:$0xff]  ;;  %v147_v8 = vld [vmem:[#allocation5 + $0xe8] sm:$0xff]  ;;  %s280_s8 = sshll.u32 %s436_s7, 4  ;;  %s281_s8 = int_to_ptr.vmem [resolvable:$true] %s280_s8 }
  0x1e   :  { %v56_v5 = vadd.f32 %v487_v4, %v483_v2  ;;  %v149_v6 = vld [vmem:[#allocation5 + $0xf8] sm:$0xff]  ;;  %v148_v7 = vld [vmem:[#allocation5 + $0xf0] sm:$0xff]  ;;  %v146_v9 = vld [vmem:[#allocation5 + $0xe0] sm:$0xff]  ;;  %s406_s9 = scalar_lea.vmem %s281_s8, 512  ;;  %p411_p11 = scmp.lt.s32.totalorder %s281_s8, %s281_s8 }
  0x1f   :  { %54 = vadd.xlane.f32.xlu0 %v53_v3  ;;  %194 = vmatprep.subr.mxu0 %v149_v6  ;;  %v145_v10 = vld [vmem:[#allocation5 + $0xd8] sm:$0xff]  ;;  %v144_v11 = vld [vmem:[#allocation5 + $0xd0] sm:$0xff]  ;;  %v143_v12 = vld [vmem:[#allocation5 + $0xc8] sm:$0xff]  ;;  %p407_p10 = scmp.ne.s32.totalorder %s281_s8, %s406_s9  ;;  %p412_p12 = scmp.lt.s32.totalorder %s406_s9, %s406_s9 }
  0x20   :  { %293 = vmatprep.subr.mxu1 %v149_v6  ;;  %195 = vmatpush1.msra.mxu0 %v148_v7  ;;  %v142_v13 = vld [vmem:[#allocation5 + $0xc0] sm:$0xff]  ;;  %v141_v14 = vld [vmem:[#allocation5 + $0xb8] sm:$0xff]  ;;  %v140_v15 = vld [vmem:[#allocation5 + $0xb0] sm:$0xff] }
  0x21   :  { %325 = vmatpush1.msra.mxu1 %v148_v7  ;;  %196 = vmatprep.subr.mxu0 %v147_v8  ;;  %v139_v16 = vld [vmem:[#allocation5 + $0xa8] sm:$0xff]  ;;  %v138_v17 = vld [vmem:[#allocation5 + $0xa0] sm:$0xff]  ;;  %v137_v18 = vld [vmem:[#allocation5 + $0x98] sm:$0xff]  ;;  %p413_p13 = por %p412_p12, %p411_p11 }
  0x22   :  { %294 = vmatprep.subr.mxu1 %v147_v8  ;;  %197 = vmatpush1.msra.mxu0 %v146_v9  ;;  %v136_v19 = vld [vmem:[#allocation5 + $0x90] sm:$0xff]  ;;  %v135_v20 = vld [vmem:[#allocation5 + $0x88] sm:$0xff]  ;;  %v134_v21 = vld [vmem:[#allocation5 + $0x80] sm:$0xff] }
  0x23   :  { %57 = vadd.xlane.f32.xlu0 %v56_v5  ;;  %326 = vmatpush1.msra.mxu1 %v146_v9  ;;  %v133_v22 = vld [vmem:[#allocation5 + $0x78] sm:$0xff]  ;;  %v132_v23 = vld [vmem:[#allocation5 + $0x70] sm:$0xff]  ;;  %v131_v24 = vld [vmem:[#allocation5 + $0x68] sm:$0xff]  ;;  %p414_p0 = pnand %p413_p13, %p407_p10 }
  0x24   :  { %198 = vmatprep.subr.mxu0 %v145_v10  ;;  %295 = vmatprep.subr.mxu1 %v145_v10  ;;  %v130_v25 = vld [vmem:[#allocation5 + $0x60] sm:$0xff]  ;;  %v129_v26 = vld [vmem:[#allocation5 + $0x58] sm:$0xff]  ;;  %v128_v27 = vld [vmem:[#allocation5 + $0x50] sm:$0xff] }
  0x25   :  { %199 = vmatpush1.msra.mxu0 %v144_v11  ;;  %327 = vmatpush1.msra.mxu1 %v144_v11  ;;  %v127_v28 = vld [vmem:[#allocation5 + $0x48] sm:$0xff]  ;;  %v126_v29 = vld [vmem:[#allocation5 + $0x40] sm:$0xff]  ;;  %v125_v30 = vld [vmem:[#allocation5 + $0x38] sm:$0xff] }
  0x26   :  { %200 = vmatprep.subr.mxu0 %v143_v12  ;;  %296 = vmatprep.subr.mxu1 %v143_v12  ;;  %v124_v31 = vld [vmem:[#allocation5 + $0x30] sm:$0xff]  ;;  %v123_v32 = vld [vmem:[#allocation5 + $0x28] sm:$0xff]  ;;  %v122_v33 = vld [vmem:[#allocation5 + $0x20] sm:$0xff] }
  0x27   :  { %201 = vmatpush1.msra.mxu0 %v142_v13  ;;  %328 = vmatpush1.msra.mxu1 %v142_v13  ;;  %v121_v34 = vld [vmem:[#allocation5 + $0x18] sm:$0xff]  ;;  %v120_v35 = vld [vmem:[#allocation5 + $0x10] sm:$0xff]  ;;  %v119_v36 = vld [vmem:[#allocation5 + $0x8] sm:$0xff] }
  0x28   :  { %202 = vmatprep.subr.mxu0 %v141_v14  ;;  %297 = vmatprep.subr.mxu1 %v141_v14  ;;  %v118_v37 = vld [vmem:[#allocation5] sm:$0xff]  ;;  %v181_v38 = vld [vmem:[#allocation5 + $0x1f8] sm:$0xff]  ;;  %v180_v39 = vld [vmem:[#allocation5 + $0x1f0] sm:$0xff] }
  0x29   :  { %203 = vmatpush1.msra.mxu0 %v140_v15  ;;  %329 = vmatpush1.msra.mxu1 %v140_v15  ;;  %v179_v40 = vld [vmem:[#allocation5 + $0x1e8] sm:$0xff]  ;;  %v178_v41 = vld [vmem:[#allocation5 + $0x1e0] sm:$0xff]  ;;  %v177_v42 = vld [vmem:[#allocation5 + $0x1d8] sm:$0xff] }
  0x2a   :  { %204 = vmatprep.subr.mxu0 %v139_v16  ;;  %298 = vmatprep.subr.mxu1 %v139_v16  ;;  %v176_v43 = vld [vmem:[#allocation5 + $0x1d0] sm:$0xff]  ;;  %v175_v44 = vld [vmem:[#allocation5 + $0x1c8] sm:$0xff]  ;;  %v174_v59 = vld [vmem:[#allocation5 + $0x1c0] sm:$0xff] }
  0x2b   :  { %205 = vmatpush1.msra.mxu0 %v138_v17  ;;  %330 = vmatpush1.msra.mxu1 %v138_v17  ;;  %v173_v60 = vld [vmem:[#allocation5 + $0x1b8] sm:$0xff]  ;;  %v172_v61 = vld [vmem:[#allocation5 + $0x1b0] sm:$0xff]  ;;  %v171_v62 = vld [vmem:[#allocation5 + $0x1a8] sm:$0xff] }
  0x2c   :  { %206 = vmatprep.subr.mxu0 %v137_v18  ;;  %299 = vmatprep.subr.mxu1 %v137_v18  ;;  %v170_v63 = vld [vmem:[#allocation5 + $0x1a0] sm:$0xff]  ;;  %v164_v5 = vld [vmem:[#allocation5 + $0x170] sm:$0xff]  ;;  %v163_v6 = vld [vmem:[#allocation5 + $0x168] sm:$0xff] }
  0x2d   :  { %207 = vmatpush1.msra.mxu0 %v136_v19  ;;  %331 = vmatpush1.msra.mxu1 %v136_v19  ;;  %v166_v3 = vld [vmem:[#allocation5 + $0x180] sm:$0xff]  ;;  %v161_v8 = vld [vmem:[#allocation5 + $0x158] sm:$0xff]  ;;  %v160_v9 = vld [vmem:[#allocation5 + $0x150] sm:$0xff] }
  0x2e   :  { %208 = vmatprep.subr.mxu0 %v135_v20  ;;  %300 = vmatprep.subr.mxu1 %v135_v20  ;;  %v162_v7 = vld [vmem:[#allocation5 + $0x160] sm:$0xff]  ;;  %v159_v10 = vld [vmem:[#allocation5 + $0x148] sm:$0xff]  ;;  %v157_v12 = vld [vmem:[#allocation5 + $0x138] sm:$0xff] }
  0x2f   :  { %209 = vmatpush1.msra.mxu0 %v134_v21  ;;  %332 = vmatpush1.msra.mxu1 %v134_v21  ;;  %v158_v11 = vld [vmem:[#allocation5 + $0x140] sm:$0xff]  ;;  %v156_v13 = vld [vmem:[#allocation5 + $0x130] sm:$0xff]  ;;  %v155_v14 = vld [vmem:[#allocation5 + $0x128] sm:$0xff] }
  0x30   :  { %210 = vmatprep.subr.mxu0 %v133_v22  ;;  %301 = vmatprep.subr.mxu1 %v133_v22  ;;  %v154_v15 = vld [vmem:[#allocation5 + $0x120] sm:$0xff]  ;;  %v153_v16 = vld [vmem:[#allocation5 + $0x118] sm:$0xff]  ;;  %v152_v17 = vld [vmem:[#allocation5 + $0x110] sm:$0xff] }
  0x31   :  { %211 = vmatpush1.msra.mxu0 %v132_v23  ;;  %333 = vmatpush1.msra.mxu1 %v132_v23  ;;  %v151_v18 = vld [vmem:[#allocation5 + $0x108] sm:$0xff]  ;;  %v150_v19 = vld [vmem:[#allocation5 + $0x100] sm:$0xff] }
  0x32   :  { %212 = vmatprep.subr.mxu0 %v131_v24  ;;  %302 = vmatprep.subr.mxu1 %v131_v24 }
  0x33   :  { %213 = vmatpush1.msra.mxu0 %v130_v25  ;;  %334 = vmatpush1.msra.mxu1 %v130_v25  ;;  %v88_v25 = vlaneseq }
  0x34   :  { %214 = vmatprep.subr.mxu0 %v129_v26  ;;  %303 = vmatprep.subr.mxu1 %v129_v26 }
  0x35   :  { %215 = vmatpush1.msra.mxu0 %v128_v27  ;;  %335 = vmatpush1.msra.mxu1 %v128_v27  ;;  %v89_v27 = vshrl.u32 %v88_v25, 7 }
  0x36   :  { %216 = vmatprep.subr.mxu0 %v127_v28  ;;  %304 = vmatprep.subr.mxu1 %v127_v28 }
  0x37   :  { %217 = vmatpush1.msra.mxu0 %v126_v29  ;;  %336 = vmatpush1.msra.mxu1 %v126_v29  ;;  %v90_v28 = vsub.s32 0, %v89_v27  ;;  %v94_v29 = vsub.s32 1, %v89_v27 }
  0x38   :  { %218 = vmatprep.subr.mxu0 %v125_v30  ;;  %305 = vmatprep.subr.mxu1 %v125_v30  ;;  %v86_v30 = vld [vmem:[%s531_s1] sm:$0x3] }
  0x39   :  { %219 = vmatpush1.msra.mxu0 %v124_v31  ;;  %337 = vmatpush1.msra.mxu1 %v124_v31  ;;  %v102_v31 = vld [vmem:[%s532_s2] sm:$0x3] }
  0x3a   :  { %220 = vmatprep.subr.mxu0 %v123_v32  ;;  %306 = vmatprep.subr.mxu1 %v123_v32  ;;  %v91_v32 = vrot.slane %v86_v30, %v90_v28 }
  0x3b   :  { %221 = vmatpush1.msra.mxu0 %v122_v33  ;;  %338 = vmatpush1.msra.mxu1 %v122_v33  ;;  %v95_v33 = vrot.slane %v86_v30, %v94_v29 }
  0x3c   :  { %222 = vmatprep.subr.mxu0 %v121_v34  ;;  %307 = vmatprep.subr.mxu1 %v121_v34 }
  0x3d   :  { %223 = vmatpush1.msra.mxu0 %v120_v35  ;;  %339 = vmatpush1.msra.mxu1 %v120_v35 }
  0x3e   :  { %224 = vmatprep.subr.mxu0 %v119_v36  ;;  %308 = vmatprep.subr.mxu1 %v119_v36  ;;  %v107_v36 = vrot.slane %v102_v31, %v90_v28 }
  0x3f   :  { %225 = vmatpush1.msra.mxu0 %v118_v37  ;;  %340 = vmatpush1.msra.mxu1 %v118_v37  ;;  %v111_v37 = vrot.slane %v102_v31, %v94_v29 }
  0x40   :  { %226 = vmatprep.subr.mxu0 %v181_v38  ;;  %309 = vmatprep.subr.mxu1 %v181_v38 }
  0x41   :  { %227 = vmatpush2.msra.mxu0 %v180_v39  ;;  %341 = vmatpush2.msra.mxu1 %v180_v39 }
  0x42   :  { %228 = vmatprep.subr.mxu0 %v179_v40  ;;  %310 = vmatprep.subr.mxu1 %v179_v40 }
  0x43   :  { %229 = vmatpush2.msra.mxu0 %v178_v41  ;;  %342 = vmatpush2.msra.mxu1 %v178_v41 }
  0x44   :  { %230 = vmatprep.subr.mxu0 %v177_v42  ;;  %311 = vmatprep.subr.mxu1 %v177_v42 }
  0x45   :  { %231 = vmatpush2.msra.mxu0 %v176_v43  ;;  %343 = vmatpush2.msra.mxu1 %v176_v43 }
  0x46   :  { %232 = vmatprep.subr.mxu0 %v175_v44  ;;  %312 = vmatprep.subr.mxu1 %v175_v44 }
  0x47   :  { %233 = vmatpush2.msra.mxu0 %v174_v59  ;;  %344 = vmatpush2.msra.mxu1 %v174_v59 }
  0x48   :  { %234 = vmatprep.subr.mxu0 %v173_v60  ;;  %313 = vmatprep.subr.mxu1 %v173_v60 }
  0x49   :  { %235 = vmatpush2.msra.mxu0 %v172_v61  ;;  %345 = vmatpush2.msra.mxu1 %v172_v61 }
  0x4a   :  { %236 = vmatprep.subr.mxu0 %v171_v62  ;;  %314 = vmatprep.subr.mxu1 %v171_v62 }
  0x4b   :  { %237 = vmatpush2.msra.mxu0 %v170_v63  ;;  %346 = vmatpush2.msra.mxu1 %v170_v63 }
  0xa8   :  { %v55_v45 = vpop.xlane.xlu0 %54 }
  0xa9   :  { %v60_v46 = vmul.f32 0.00390625, %v55_v45 }
  0xab   :  { %v492_v47 = vsub.f32 %v479_v0, %v60_v46  ;;  %v495_v48 = vsub.f32 %v481_v1, %v60_v46  ;;  %v169_v0 = vld [vmem:[#allocation5 + $0x198] sm:$0xff]  ;;  %v168_v1 = vld [vmem:[#allocation5 + $0x190] sm:$0xff] }
  0xac   :  { %v58_v49 = vpop.xlane.xlu0 %57  ;;  %238 = vmatprep.subr.mxu0 %v169_v0  ;;  %315 = vmatprep.subr.mxu1 %v169_v0 }
  0xad   :  { %v61_v50 = vmul.f32 0.00390625, %v58_v49  ;;  %v66_v51 = vmul.f32 %v492_v47, %v492_v47  ;;  %v67_v52 = vmul.f32 %v495_v48, %v495_v48  ;;  %239 = vmatpush2.msra.mxu0 %v168_v1  ;;  %347 = vmatpush2.msra.mxu1 %v168_v1 }
  0xaf   :  { %v502_v53 = vsub.f32 %v483_v2, %v61_v50  ;;  %v505_v54 = vsub.f32 %v487_v4, %v61_v50  ;;  %v70_v55 = vadd.f32 %v67_v52, %v66_v51  ;;  %v167_v2 = vld [vmem:[#allocation5 + $0x188] sm:$0xff]  ;;  %v165_v4 = vld [vmem:[#allocation5 + $0x178] sm:$0xff] }
  0xb0   :  { %240 = vmatprep.subr.mxu0 %v167_v2  ;;  %316 = vmatprep.subr.mxu1 %v167_v2 }
  0xb1   :  { %71 = vadd.xlane.f32.xlu1 %v70_v55  ;;  %v68_v56 = vmul.f32 %v502_v53, %v502_v53  ;;  %v69_v57 = vmul.f32 %v505_v54, %v505_v54  ;;  %241 = vmatpush2.msra.mxu0 %v166_v3 }
  0xb2   :  { %348 = vmatpush2.msra.mxu1 %v166_v3  ;;  %242 = vmatprep.subr.mxu0 %v165_v4 }
  0xb3   :  { %v73_v58 = vadd.f32 %v69_v57, %v68_v56  ;;  %317 = vmatprep.subr.mxu1 %v165_v4  ;;  %243 = vmatpush2.msra.mxu0 %v164_v5 }
  0xb4   :  { %349 = vmatpush2.msra.mxu1 %v164_v5  ;;  %244 = vmatprep.subr.mxu0 %v163_v6 }
  0xb5   :  { %74 = vadd.xlane.f32.xlu1 %v73_v58  ;;  %318 = vmatprep.subr.mxu1 %v163_v6 }
  0xb6   :  { %245 = vmatpush2.msra.mxu0 %v162_v7  ;;  %350 = vmatpush2.msra.mxu1 %v162_v7 }
  0xb7   :  { %246 = vmatprep.subr.mxu0 %v161_v8  ;;  %319 = vmatprep.subr.mxu1 %v161_v8 }
  0xb8   :  { %247 = vmatpush2.msra.mxu0 %v160_v9  ;;  %351 = vmatpush2.msra.mxu1 %v160_v9 }
  0xb9   :  { %248 = vmatprep.subr.mxu0 %v159_v10  ;;  %320 = vmatprep.subr.mxu1 %v159_v10 }
  0xba   :  { %249 = vmatpush2.msra.mxu0 %v158_v11  ;;  %352 = vmatpush2.msra.mxu1 %v158_v11 }
  0xbb   :  { %250 = vmatprep.subr.mxu0 %v157_v12  ;;  %321 = vmatprep.subr.mxu1 %v157_v12 }
  0xbc   :  { %251 = vmatpush2.msra.mxu0 %v156_v13  ;;  %353 = vmatpush2.msra.mxu1 %v156_v13 }
  0xbd   :  { %252 = vmatprep.subr.mxu0 %v155_v14  ;;  %322 = vmatprep.subr.mxu1 %v155_v14 }
  0xbe   :  { %253 = vmatpush2.msra.mxu0 %v154_v15  ;;  %354 = vmatpush2.msra.mxu1 %v154_v15 }
  0xbf   :  { %254 = vmatprep.subr.mxu0 %v153_v16  ;;  %323 = vmatprep.subr.mxu1 %v153_v16 }
  0xc0   :  { %255 = vmatpush2.msra.mxu0 %v152_v17  ;;  %355 = vmatpush2.msra.mxu1 %v152_v17 }
  0xc1   :  { %256 = vmatprep.subr.mxu0 %v151_v18  ;;  %324 = vmatprep.subr.mxu1 %v151_v18 }
  0xc2   :  { %257 = vmatpush2.msra.mxu0 %v150_v19  ;;  %356 = vmatpush2.msra.mxu1 %v150_v19 }
 0x13a   :  { %v72_v20 = vpop.xlane.xlu1 %71 }
 0x13b   :  { %v76_v21 = vmul.f32 0.00390625, %v72_v20 }
 0x13d   :  { %v78_v22 = vadd.f32 1e-05, %v76_v21 }
 0x13e   :  { %v75_v23 = vpop.xlane.xlu1 %74 }
 0x13f   :  { %362 = vrsqrt.f32 %v78_v22  ;;  %v77_v24 = vmul.f32 0.00390625, %v75_v23 }
 0x141   :  { %v79_v26 = vadd.f32 1e-05, %v77_v24 }
 0x143   :  { %364 = vrsqrt.f32 %v79_v26 }
 0x14c   :  { %v363_v34 = vpop.eup %362 }
 0x14d   :  { %v83_v35 = vmul.f32 %v363_v34, %v495_v48  ;;  %v82_v38 = vmul.f32 %v363_v34, %v492_v47  ;;  %v182_v47 = vld [vmem:[%s534_s4] sm:$0x3] }
 0x14e   :  { %v187_v48 = vrot.slane %v182_v47, %v90_v28  ;;  %v191_v52 = vrot.slane %v182_v47, %v94_v29 }
 0x14f   :  { %v99_v39 = vmul.f32 %v95_v33, %v83_v35  ;;  %v98_v40 = vmul.f32 %v91_v32, %v82_v38 }
 0x150   :  { %v365_v41 = vpop.eup %364 }
 0x151   :  { %v115_v42 = vadd.f32 %v111_v37, %v99_v39  ;;  %v114_v43 = vadd.f32 %v107_v36, %v98_v40  ;;  %v85_v44 = vmul.f32 %v365_v41, %v505_v54  ;;  %v84_v45 = vmul.f32 %v365_v41, %v502_v53 }
 0x153   :  { %258 = vmatprep.mubr.f32.mxu0 %v115_v42  ;;  %v101_v46 = vmul.f32 %v95_v33, %v85_v44  ;;  %v100_v49 = vmul.f32 %v91_v32, %v84_v45 }
 0x154   :  { %259 = vmatmul.mubr.f32.vlgmr.msra.gmra.mxu0 %v114_v43 }
 0x155   :  { %v117_v50 = vadd.f32 %v111_v37, %v101_v46  ;;  %v116_v51 = vadd.f32 %v107_v36, %v100_v49 }
 0x157   :  { %264 = vmatprep.mubr.f32.mxu1 %v117_v50 }
 0x158   :  { %265 = vmatmul.mubr.f32.vlgmr.msra.gmra.mxu1 %v116_v51 }
 0x214   :  { %v260_v55 = vpop.f32.mrf.mxu0 }
 0x215   :  { %v261_v56 = vadd.f32 %v260_v55, %v187_v48 }
 0x216   :  { %v262_v57 = vpop.f32.mrf.mxu0 }
 0x217   :  { %271 = vst [vmem:[#allocation7] sm:$0xff] %v261_v56  ;;  %v263_v54 = vadd.f32 %v262_v57, %v191_v52 }
 0x218   :  { %v266_v53 = vpop.f32.mrf.mxu1 }
 0x219   :  { %272 = vst [vmem:[#allocation7 + $0x8] sm:$0xff] %v263_v54  ;;  %v267_v58 = vadd.f32 %v266_v53, %v187_v48 }
 0x21a   :  { %v268_v59 = vpop.f32.mrf.mxu1 }
 0x21b   :  { %273 = vst [vmem:[#allocation7 + $0x10] sm:$0xff] %v267_v58  ;;  %v269_v60 = vadd.f32 %v268_v59, %v191_v52 }
 0x21d   :  { %274 = vst [vmem:[#allocation7 + $0x18] sm:$0xff] %v269_v60 }
 0x21e   :  { %417 = shalt.err (!%p414_p0)
}
 0x21f   :  { %286 = dma.vmem_to_hbm [thread:$0]  %s281_s8, 512, %s535_s5, [#allocation4], %s433_s21, %s433_s21, %s434_s22  }
 0x220   :  { %430 = dma.done.wait [#allocation4], 512  }
 0x221   :  { %431 = vsyncadd [#allocation4], 4294966784 }
 0x222   :  { %290 = vsyncpa [#allocation3], 1 }
 0x223   :  { %291 = vsyncpa [#allocation6], 1 }
 0x224   :  { %292 = vsyncpa [#allocation4], 1 }

</bundles_post_ra>
